<compile_context>
chip_gen: v6e
topology: v6e:2x2x1
jax: 0.10.0
libtpu: 0.0.40
codegen_flags: <defaults>
</compile_context>

<pallas_src>
import jax
import jax.numpy as jnp
from jax.experimental import pallas as pl
from jax.experimental.pallas import tpu as pltpu

LANE = 128  # TPU vreg lane width; last block dim is kept a multiple of this


# ------------------------------- Pallas kernel ------------------------------ #

def mtransh_kernel(r_ref, norm_ref, coef_ref, *rest):
    """Fused MTransH scoring for one lane-tile of the batch.

    Transposed layout: emb_dim D on the sublane axis, batch tile TB on the lane axis.

      r, norm : (D, TB)   R1[r_idx]^T, R2[r_idx]^T
      coef    : (K, TB)   b_k(r_idx) * ms[:, k]     (pre-folded per-row scalars)
      e_k     : (D, TB)   K entity-slot embeddings E[ek_idx]^T   (leading refs of *rest)
      out     : (1, TB)   -|| r + sum_k proj(e_k) * coef_k ||_2  (last ref of *rest)

    Projection is linear, so the K per-slot projections collapse into one:
        S = sum_k coef_k * e_k ;   x = r + S - (S . n) * n
    """
    e_refs, out_ref = rest[:-1], rest[-1]
    n = norm_ref[...]                                            # (D, TB)

    s = e_refs[0][...] * coef_ref[pl.ds(0, 1), :]                # (D, TB)
    for k in range(1, len(e_refs)):                              # static unroll over K=6
        s = s + e_refs[k][...] * coef_ref[pl.ds(k, 1), :]

    x = r_ref[...] + s - jnp.sum(s * n, axis=0, keepdims=True) * n
    # TODO(synk): hidden_drop (Dropout) treated in eval mode -> identity.
    out_ref[...] = -jnp.sqrt(jnp.sum(x * x, axis=0, keepdims=True))   # (1, TB) lane-dense


# ------------------------------- call wrapper -------------------------------- #

def _pick_lane_tile(b_pad):
    for tb in (512, 256, 128):
        if b_pad % tb == 0:
            return tb
    return b_pad  # unreachable: b_pad is always a multiple of LANE


def mtransh_forward(params, r_idx, e_idx, ms):
    """r_idx: (B,) int32; e_idx: (K=6, B) int32; ms: (B, K) f32 mask. Returns (B,) scores."""
    E_T, R1_T, R2_T, b_all = params["E_T"], params["R1_T"], params["R2_T"], params["b"]
    D = E_T.shape[0]
    K, B = e_idx.shape

    # Pad the batch up to a lane multiple (index 0 is a valid padding row; ms pads to 0).
    B_pad = ((B + LANE - 1) // LANE) * LANE
    pad = B_pad - B
    r_idx_p = jnp.pad(r_idx, (0, pad))
    e_idx_p = jnp.pad(e_idx, ((0, 0), (0, pad)))
    ms_p = jnp.pad(ms.astype(jnp.float32), ((0, pad), (0, 0)))

    # Embedding lookups (plain-JAX glue): tables are pre-transposed so every gather yields
    # the (D, batch) layout the kernel consumes directly -- no swapaxes materialization.
    r_t = R1_T[:, r_idx_p]                                    # (D, B_pad)
    norm_t = R2_T[:, r_idx_p]                                 # (D, B_pad)
    coef = (b_all[r_idx_p] * ms_p).T                          # (K, B_pad)
    e_ts = [E_T[:, e_idx_p[k]] for k in range(K)]             # K x (D, B_pad)

    TB = _pick_lane_tile(B_pad)
    grid = (B_pad // TB,)
    lane_map = lambda i: (0, i)

    in_specs = ([pl.BlockSpec((D, TB), lane_map),             # r
                 pl.BlockSpec((D, TB), lane_map),             # norm
                 pl.BlockSpec((K, TB), lane_map)]             # coef (K == full dim -> ok)
                + [pl.BlockSpec((D, TB), lane_map) for _ in range(K)])   # e_1..e_K

    out = pl.pallas_call(
        mtransh_kernel,
        out_shape=jax.ShapeDtypeStruct((1, B_pad), jnp.float32),
        grid=grid,
        in_specs=in_specs,
        out_specs=pl.BlockSpec((1, TB), lane_map),
        compiler_params=pltpu.CompilerParams(
            dimension_semantics=("parallel",)),               # 2-TC sharding on v7x
    )(r_t, norm_t, coef, *e_ts)
    return out.reshape(B_pad)[:B]


# --------------------------------- reference --------------------------------- #

def mtransh_reference(params, r_idx, e_idx, ms):
    E, R1, R2 = params["E_T"].T, params["R1_T"].T, params["R2_T"].T
    b_all = params["b"]
    x = R1[r_idx]
    norm = R2[r_idx]
    for k in range(e_idx.shape[0]):
        orig = E[e_idx[k]]
        pnr = orig - jnp.sum(orig * norm, axis=1, keepdims=True) * norm
        x = x + pnr * b_all[r_idx, k][:, None] * ms[:, k][:, None]
    return -jnp.sqrt(jnp.sum(x * x, axis=1))


# ----------------------------------- main ------------------------------------ #

if __name__ == "__main__":
    D = 32            # emb_dim
    num_ent = 20      # dataset.num_ent()
    num_rel = 5       # dataset.num_rel()
    K = 6             # six entity slots (e1..e6)

    key = jax.random.PRNGKey(0)
    ks = jax.random.split(key, 10)

    def _emb(k, n):
        # mirrors init(): normal rows, L2-normalized, row 0 = ones
        w = jax.random.normal(k, (n, D), jnp.float32)
        w = w / jnp.linalg.norm(w, axis=1, keepdims=True)
        return w.at[0].set(jnp.ones((D,), jnp.float32))

    params = dict(
        E_T=_emb(ks[0], num_ent).T,                                    # (D, num_ent)
        R1_T=_emb(ks[1], num_rel).T,                                   # (D, num_rel)
        R2_T=_emb(ks[2], num_rel).T,                                   # (D, num_rel)
        b=0.5 * jax.random.normal(ks[3], (num_rel, K), jnp.float32),   # columns = b0..b5
    )

    fwd = jax.jit(mtransh_forward)

    # Case 1: tiny batch (pads to one 128-lane tile, grid=(1,)).
    B = 4
    r_idx = jax.random.randint(ks[4], (B,), 0, num_rel).astype(jnp.int32)
    e_idx = jax.random.randint(ks[5], (K, B), 0, num_ent).astype(jnp.int32)
    ms = (jax.random.uniform(ks[6], (B, K)) > 0.3).astype(jnp.float32)
    out = jax.block_until_ready(fwd(params, r_idx, e_idx, ms))
    ref = mtransh_reference(params, r_idx, e_idx, ms)
    assert out.shape == (B,)
    assert jnp.allclose(out, ref, rtol=1e-4, atol=1e-5), (out, ref)

    # Case 2: non-multiple-of-128 batch (pads to 384, TB=128, grid=(3,)) to exercise tiling.
    B2 = 300
    r_idx2 = jax.random.randint(ks[7], (B2,), 0, num_rel).astype(jnp.int32)
    e_idx2 = jax.random.randint(ks[8], (K, B2), 0, num_ent).astype(jnp.int32)
    ms2 = (jax.random.uniform(ks[9], (B2, K)) > 0.3).astype(jnp.float32)
    out2 = jax.block_until_ready(fwd(params, r_idx2, e_idx2, ms2))
    ref2 = mtransh_reference(params, r_idx2, e_idx2, ms2)
    assert out2.shape == (B2,)
    assert jnp.allclose(out2, ref2, rtol=1e-4, atol=1e-5), (out2, ref2)

    print("KERNEL_OK")
</pallas_src>

<mosaic_0001>
module attributes {stable_mosaic.version = 11 : i64} {
  func.func @mtransh_kernel(%arg0: i32, %arg1: memref<32x128xf32, #tpu.memory_space<vmem>>, %arg2: memref<32x128xf32, #tpu.memory_space<vmem>>, %arg3: memref<6x128xf32, #tpu.memory_space<vmem>>, %arg4: memref<32x128xf32, #tpu.memory_space<vmem>>, %arg5: memref<32x128xf32, #tpu.memory_space<vmem>>, %arg6: memref<32x128xf32, #tpu.memory_space<vmem>>, %arg7: memref<32x128xf32, #tpu.memory_space<vmem>>, %arg8: memref<32x128xf32, #tpu.memory_space<vmem>>, %arg9: memref<32x128xf32, #tpu.memory_space<vmem>>, %arg10: memref<1x128xf32, #tpu.memory_space<vmem>>) attributes {dimension_semantics = [#tpu.dimension_semantics<parallel>], iteration_bounds = array<i64: 1>, scalar_prefetch = 0 : i64, scratch_operands = 0 : i64, tpu.core_type = #tpu.core_type<tc>, window_params = [{transform_indices = @transform_0, window_bounds = array<i64: 32, 128>}, {transform_indices = @transform_1, window_bounds = array<i64: 32, 128>}, {transform_indices = @transform_2, window_bounds = array<i64: 6, 128>}, {transform_indices = @transform_3, window_bounds = array<i64: 32, 128>}, {transform_indices = @transform_4, window_bounds = array<i64: 32, 128>}, {transform_indices = @transform_5, window_bounds = array<i64: 32, 128>}, {transform_indices = @transform_6, window_bounds = array<i64: 32, 128>}, {transform_indices = @transform_7, window_bounds = array<i64: 32, 128>}, {transform_indices = @transform_8, window_bounds = array<i64: 32, 128>}, {transform_indices = @transform_9, window_bounds = array<i64: 1, 128>}]} {
    %c0 = arith.constant 0 : index
    %c0_0 = arith.constant 0 : index
    %0 = vector.load %arg2[%c0, %c0_0] : memref<32x128xf32, #tpu.memory_space<vmem>>, vector<32x128xf32>
    %c0_1 = arith.constant 0 : index
    %c0_2 = arith.constant 0 : index
    %1 = vector.load %arg4[%c0_1, %c0_2] : memref<32x128xf32, #tpu.memory_space<vmem>>, vector<32x128xf32>
    %c0_3 = arith.constant 0 : index
    %c0_4 = arith.constant 0 : index
    %2 = vector.load %arg3[%c0_3, %c0_4] : memref<6x128xf32, #tpu.memory_space<vmem>>, vector<1x128xf32>
    %3 = vector.broadcast %2 : vector<1x128xf32> to vector<32x128xf32>
    %4 = arith.mulf %1, %3 : vector<32x128xf32>
    %c0_5 = arith.constant 0 : index
    %c0_6 = arith.constant 0 : index
    %5 = vector.load %arg5[%c0_5, %c0_6] : memref<32x128xf32, #tpu.memory_space<vmem>>, vector<32x128xf32>
    %c1 = arith.constant 1 : index
    %c0_7 = arith.constant 0 : index
    %6 = vector.load %arg3[%c1, %c0_7] : memref<6x128xf32, #tpu.memory_space<vmem>>, vector<1x128xf32>
    %7 = vector.broadcast %6 : vector<1x128xf32> to vector<32x128xf32>
    %8 = arith.mulf %5, %7 : vector<32x128xf32>
    %9 = arith.addf %4, %8 : vector<32x128xf32>
    %c0_8 = arith.constant 0 : index
    %c0_9 = arith.constant 0 : index
    %10 = vector.load %arg6[%c0_8, %c0_9] : memref<32x128xf32, #tpu.memory_space<vmem>>, vector<32x128xf32>
    %c2 = arith.constant 2 : index
    %c0_10 = arith.constant 0 : index
    %11 = vector.load %arg3[%c2, %c0_10] : memref<6x128xf32, #tpu.memory_space<vmem>>, vector<1x128xf32>
    %12 = vector.broadcast %11 : vector<1x128xf32> to vector<32x128xf32>
    %13 = arith.mulf %10, %12 : vector<32x128xf32>
    %14 = arith.addf %9, %13 : vector<32x128xf32>
    %c0_11 = arith.constant 0 : index
    %c0_12 = arith.constant 0 : index
    %15 = vector.load %arg7[%c0_11, %c0_12] : memref<32x128xf32, #tpu.memory_space<vmem>>, vector<32x128xf32>
    %c3 = arith.constant 3 : index
    %c0_13 = arith.constant 0 : index
    %16 = vector.load %arg3[%c3, %c0_13] : memref<6x128xf32, #tpu.memory_space<vmem>>, vector<1x128xf32>
    %17 = vector.broadcast %16 : vector<1x128xf32> to vector<32x128xf32>
    %18 = arith.mulf %15, %17 : vector<32x128xf32>
    %19 = arith.addf %14, %18 : vector<32x128xf32>
    %c0_14 = arith.constant 0 : index
    %c0_15 = arith.constant 0 : index
    %20 = vector.load %arg8[%c0_14, %c0_15] : memref<32x128xf32, #tpu.memory_space<vmem>>, vector<32x128xf32>
    %c4 = arith.constant 4 : index
    %c0_16 = arith.constant 0 : index
    %21 = vector.load %arg3[%c4, %c0_16] : memref<6x128xf32, #tpu.memory_space<vmem>>, vector<1x128xf32>
    %22 = vector.broadcast %21 : vector<1x128xf32> to vector<32x128xf32>
    %23 = arith.mulf %20, %22 : vector<32x128xf32>
    %24 = arith.addf %19, %23 : vector<32x128xf32>
    %c0_17 = arith.constant 0 : index
    %c0_18 = arith.constant 0 : index
    %25 = vector.load %arg9[%c0_17, %c0_18] : memref<32x128xf32, #tpu.memory_space<vmem>>, vector<32x128xf32>
    %c5 = arith.constant 5 : index
    %c0_19 = arith.constant 0 : index
    %26 = vector.load %arg3[%c5, %c0_19] : memref<6x128xf32, #tpu.memory_space<vmem>>, vector<1x128xf32>
    %27 = vector.broadcast %26 : vector<1x128xf32> to vector<32x128xf32>
    %28 = arith.mulf %25, %27 : vector<32x128xf32>
    %29 = arith.addf %24, %28 : vector<32x128xf32>
    %c0_20 = arith.constant 0 : index
    %c0_21 = arith.constant 0 : index
    %30 = vector.load %arg1[%c0_20, %c0_21] : memref<32x128xf32, #tpu.memory_space<vmem>>, vector<32x128xf32>
    %31 = arith.addf %30, %29 : vector<32x128xf32>
    %32 = arith.mulf %29, %0 : vector<32x128xf32>
    %cst = arith.constant dense<0.000000e+00> : vector<128xf32>
    %33 = vector.multi_reduction <add>, %32, %cst [0] : vector<32x128xf32> to vector<128xf32>
    %34 = vector.shape_cast %33 : vector<128xf32> to vector<1x128xf32>
    %35 = vector.broadcast %34 : vector<1x128xf32> to vector<32x128xf32>
    %36 = arith.mulf %35, %0 : vector<32x128xf32>
    %37 = arith.subf %31, %36 : vector<32x128xf32>
    %38 = arith.mulf %37, %37 : vector<32x128xf32>
    %cst_22 = arith.constant dense<0.000000e+00> : vector<128xf32>
    %39 = vector.multi_reduction <add>, %38, %cst_22 [0] : vector<32x128xf32> to vector<128xf32>
    %40 = vector.shape_cast %39 : vector<128xf32> to vector<1x128xf32>
    %41 = math.sqrt %40 : vector<1x128xf32>
    %cst_23 = arith.constant 0.000000e+00 : f32
    %42 = vector.broadcast %cst_23 : f32 to vector<1x128xf32>
    %43 = arith.subf %42, %41 : vector<1x128xf32>
    %c0_24 = arith.constant 0 : index
    %c0_25 = arith.constant 0 : index
    %44 = vector.load %arg10[%c0_24, %c0_25] : memref<1x128xf32, #tpu.memory_space<vmem>>, vector<1x128xf32>
    tpu.vector_store %arg10[%c0_24, %c0_25], %43 {strides = array<i32>} : memref<1x128xf32, #tpu.memory_space<vmem>>, vector<1x128xf32>,
    return
  }
  func.func @transform_0(%arg0: i32) -> (i32, i32) {
    %c0_i32 = arith.constant 0 : i32
    %c0_i32_0 = arith.constant 0 : i32
    return %c0_i32, %arg0 : i32, i32
  }
  func.func @transform_1(%arg0: i32) -> (i32, i32) {
    %c0_i32 = arith.constant 0 : i32
    %c0_i32_0 = arith.constant 0 : i32
    return %c0_i32, %arg0 : i32, i32
  }
  func.func @transform_2(%arg0: i32) -> (i32, i32) {
    %c0_i32 = arith.constant 0 : i32
    %c0_i32_0 = arith.constant 0 : i32
    return %c0_i32, %arg0 : i32, i32
  }
  func.func @transform_3(%arg0: i32) -> (i32, i32) {
    %c0_i32 = arith.constant 0 : i32
    %c0_i32_0 = arith.constant 0 : i32
    return %c0_i32, %arg0 : i32, i32
  }
  func.func @transform_4(%arg0: i32) -> (i32, i32) {
    %c0_i32 = arith.constant 0 : i32
    %c0_i32_0 = arith.constant 0 : i32
    return %c0_i32, %arg0 : i32, i32
  }
  func.func @transform_5(%arg0: i32) -> (i32, i32) {
    %c0_i32 = arith.constant 0 : i32
    %c0_i32_0 = arith.constant 0 : i32
    return %c0_i32, %arg0 : i32, i32
  }
  func.func @transform_6(%arg0: i32) -> (i32, i32) {
    %c0_i32 = arith.constant 0 : i32
    %c0_i32_0 = arith.constant 0 : i32
    return %c0_i32, %arg0 : i32, i32
  }
  func.func @transform_7(%arg0: i32) -> (i32, i32) {
    %c0_i32 = arith.constant 0 : i32
    %c0_i32_0 = arith.constant 0 : i32
    return %c0_i32, %arg0 : i32, i32
  }
  func.func @transform_8(%arg0: i32) -> (i32, i32) {
    %c0_i32 = arith.constant 0 : i32
    %c0_i32_0 = arith.constant 0 : i32
    return %c0_i32, %arg0 : i32, i32
  }
  func.func @transform_9(%arg0: i32) -> (i32, i32) {
    %c0_i32 = arith.constant 0 : i32
    %c0_i32_0 = arith.constant 0 : i32
    return %c0_i32, %arg0 : i32, i32
  }
}

</mosaic_0001>

<bundles_post_ra>
// kernel: mtransh_forward.1
= control target key start
LH: loop header
LB: loop body
LE: loop exit
PB: predicated region body
PF: predicated region fallthrough
CT: control target
= control target key end

     0   :  { %s364_s2 = inlined_call_operand.vmem [shape: f32[6,128], index: 2, kind: input, shape index: {}]   ;;  %s365_s3 = inlined_call_operand.vmem [shape: f32[32,128], index: 3, kind: input, shape index: {}]   ;;  %s366_s4 = inlined_call_operand.vmem [shape: f32[32,128], index: 4, kind: input, shape index: {}]   ;;  %s367_s5 = inlined_call_operand.vmem [shape: f32[32,128], index: 5, kind: input, shape index: {}]   ;;  %s368_s6 = inlined_call_operand.vmem [shape: f32[32,128], index: 6, kind: input, shape index: {}]   ;;  %s369_s7 = inlined_call_operand.vmem [shape: f32[32,128], index: 7, kind: input, shape index: {}]   ;;  %s370_s8 = inlined_call_operand.vmem [shape: f32[32,128], index: 8, kind: input, shape index: {}]   ;;  %s371_s1 = inlined_call_operand.vmem [shape: f32[32,128], index: 1, kind: input, shape index: {}]   ;;  %s372_s0 = inlined_call_operand.vmem [shape: f32[32,128], index: 0, kind: input, shape index: {}]   ;;  %s373_s9 = inlined_call_operand.vmem [shape: f32[1,128], index: 9, kind: output, shape index: {}]  }
   0x1   :  { %v36_v0 = vld [vmem:[%s365_s3] sm:$0xff]  ;;  %v37_v1 = vld [vmem:[%s365_s3 + $0x8] sm:$0xff]  ;;  %v38_v2 = vld [vmem:[%s365_s3 + $0x10] sm:$0xff] }
   0x2   :  { %v39_v3 = vld [vmem:[%s365_s3 + $0x18] sm:$0xff]  ;;  %v189_v4 = vld [vmem:[%s364_s2] ss:$0 sm:$0xff]  ;;  %v50_v10 = vld [vmem:[%s366_s4 + $0x8] sm:$0xff] }
   0x3   :  { %v45_v5 = vmul.f32 %v189_v4, %v36_v0  ;;  %v46_v6 = vmul.f32 %v189_v4, %v37_v1  ;;  %v47_v7 = vmul.f32 %v189_v4, %v38_v2  ;;  %v48_v8 = vmul.f32 %v189_v4, %v39_v3  ;;  %v49_v9 = vld [vmem:[%s366_s4] sm:$0xff]  ;;  %v51_v11 = vld [vmem:[%s366_s4 + $0x10] sm:$0xff]  ;;  %v52_v12 = vld [vmem:[%s366_s4 + $0x18] sm:$0xff] }
   0x4   :  { %v190_v13 = vld [vmem:[%s364_s2 + $0x1] ss:$0 sm:$0xff]  ;;  %v67_v19 = vld [vmem:[%s367_s5 + $0x8] sm:$0xff]  ;;  %v68_v20 = vld [vmem:[%s367_s5 + $0x10] sm:$0xff] }
   0x5   :  { %v66_v14 = vld [vmem:[%s367_s5] sm:$0xff]  ;;  %v58_v15 = vmul.f32 %v190_v13, %v49_v9  ;;  %v59_v16 = vmul.f32 %v190_v13, %v50_v10  ;;  %v60_v17 = vmul.f32 %v190_v13, %v51_v11  ;;  %v61_v18 = vmul.f32 %v190_v13, %v52_v12  ;;  %v69_v21 = vld [vmem:[%s367_s5 + $0x18] sm:$0xff]  ;;  %v84_v24 = vld [vmem:[%s368_s6 + $0x8] sm:$0xff] }
   0x6   :  { %v191_v22 = vld [vmem:[%s364_s2 + $0x2] ss:$0 sm:$0xff]  ;;  %v85_v29 = vld [vmem:[%s368_s6 + $0x10] sm:$0xff]  ;;  %v86_v30 = vld [vmem:[%s368_s6 + $0x18] sm:$0xff] }
   0x7   :  { %v83_v23 = vld [vmem:[%s368_s6] sm:$0xff]  ;;  %v62_v25 = vadd.f32 %v58_v15, %v45_v5  ;;  %v63_v26 = vadd.f32 %v59_v16, %v46_v6  ;;  %v64_v27 = vadd.f32 %v60_v17, %v47_v7  ;;  %v65_v28 = vadd.f32 %v61_v18, %v48_v8  ;;  %v101_v37 = vld [vmem:[%s369_s7 + $0x8] sm:$0xff]  ;;  %v102_v38 = vld [vmem:[%s369_s7 + $0x10] sm:$0xff] }
   0x8   :  { %v192_v31 = vld [vmem:[%s364_s2 + $0x3] ss:$0 sm:$0xff]  ;;  %v75_v32 = vmul.f32 %v191_v22, %v66_v14  ;;  %v76_v33 = vmul.f32 %v191_v22, %v67_v19  ;;  %v77_v34 = vmul.f32 %v191_v22, %v68_v20  ;;  %v78_v35 = vmul.f32 %v191_v22, %v69_v21  ;;  %v103_v43 = vld [vmem:[%s369_s7 + $0x18] sm:$0xff]  ;;  %v193_v44 = vld [vmem:[%s364_s2 + $0x4] ss:$0 sm:$0xff] }
   0x9   :  { %v100_v36 = vld [vmem:[%s369_s7] sm:$0xff]  ;;  %v92_v39 = vmul.f32 %v192_v31, %v83_v23  ;;  %v93_v40 = vmul.f32 %v192_v31, %v84_v24  ;;  %v94_v41 = vmul.f32 %v192_v31, %v85_v29  ;;  %v95_v42 = vmul.f32 %v192_v31, %v86_v30  ;;  %v118_v50 = vld [vmem:[%s370_s8 + $0x8] sm:$0xff]  ;;  %v119_v51 = vld [vmem:[%s370_s8 + $0x10] sm:$0xff] }
   0xa   :  { %v117_v45 = vld [vmem:[%s370_s8] sm:$0xff]  ;;  %v79_v46 = vadd.f32 %v75_v32, %v62_v25  ;;  %v80_v47 = vadd.f32 %v76_v33, %v63_v26  ;;  %v81_v48 = vadd.f32 %v77_v34, %v64_v27  ;;  %v82_v49 = vadd.f32 %v78_v35, %v65_v28  ;;  %v120_v52 = vld [vmem:[%s370_s8 + $0x18] sm:$0xff]  ;;  %v33_v7 = vld [vmem:[%s371_s1 + $0x8] sm:$0xff] }
   0xb   :  { %v109_v53 = vmul.f32 %v193_v44, %v100_v36  ;;  %v110_v54 = vmul.f32 %v193_v44, %v101_v37  ;;  %v111_v55 = vmul.f32 %v193_v44, %v102_v38  ;;  %v112_v56 = vmul.f32 %v193_v44, %v103_v43  ;;  %v194_v57 = vld [vmem:[%s364_s2 + $0x5] ss:$0 sm:$0xff]  ;;  %v34_v8 = vld [vmem:[%s371_s1 + $0x10] sm:$0xff]  ;;  %v35_v13 = vld [vmem:[%s371_s1 + $0x18] sm:$0xff] }
   0xc   :  { %v96_v58 = vadd.f32 %v92_v39, %v79_v46  ;;  %v97_v59 = vadd.f32 %v93_v40, %v80_v47  ;;  %v98_v60 = vadd.f32 %v94_v41, %v81_v48  ;;  %v99_v61 = vadd.f32 %v95_v42, %v82_v49  ;;  %v32_v6 = vld [vmem:[%s371_s1] sm:$0xff]  ;;  %v135_v26 = vld [vmem:[%s372_s0 + $0x8] sm:$0xff]  ;;  %v136_v27 = vld [vmem:[%s372_s0 + $0x10] sm:$0xff] }
   0xd   :  { %v126_v62 = vmul.f32 %v194_v57, %v117_v45  ;;  %v127_v63 = vmul.f32 %v194_v57, %v118_v50  ;;  %v128_v0 = vmul.f32 %v194_v57, %v119_v51  ;;  %v129_v1 = vmul.f32 %v194_v57, %v120_v52  ;;  %v134_v24 = vld [vmem:[%s372_s0] sm:$0xff]  ;;  %v137_v28 = vld [vmem:[%s372_s0 + $0x18] sm:$0xff] }
   0xe   :  { %v113_v2 = vadd.f32 %v109_v53, %v96_v58  ;;  %v114_v3 = vadd.f32 %v110_v54, %v97_v59  ;;  %v115_v4 = vadd.f32 %v111_v55, %v98_v60  ;;  %v116_v5 = vadd.f32 %v112_v56, %v99_v61 }
  0x10   :  { %v130_v9 = vadd.f32 %v126_v62, %v113_v2  ;;  %v131_v10 = vadd.f32 %v127_v63, %v114_v3  ;;  %v132_v11 = vadd.f32 %v128_v0, %v115_v4  ;;  %v133_v12 = vadd.f32 %v129_v1, %v116_v5 }
  0x12   :  { %v142_v14 = vmul.f32 %v130_v9, %v32_v6  ;;  %v143_v15 = vmul.f32 %v131_v10, %v33_v7  ;;  %v144_v16 = vmul.f32 %v132_v11, %v34_v8  ;;  %v145_v17 = vmul.f32 %v133_v12, %v35_v13 }
  0x13   :  { %v138_v30 = vadd.f32 %v134_v24, %v130_v9  ;;  %v139_v31 = vadd.f32 %v135_v26, %v131_v10  ;;  %v140_v32 = vadd.f32 %v136_v27, %v132_v11  ;;  %v141_v33 = vadd.f32 %v137_v28, %v133_v12 }
  0x14   :  { %v146_v18 = vadd.f32 %v143_v15, %v142_v14 }
  0x16   :  { %v147_v19 = vadd.f32 %v146_v18, %v144_v16 }
  0x18   :  { %v148_v20 = vadd.f32 %v147_v19, %v145_v17 }
  0x1a   :  { %v149_v21 = vrot.slane %v148_v20, 4 }
  0x1c   :  { %v150_v22 = vadd.f32 %v149_v21, %v148_v20 }
  0x1e   :  { %v151_v23 = vrot.slane %v150_v22, 2 }
  0x20   :  { %v152_v25 = vadd.f32 %v151_v23, %v150_v22 }
  0x22   :  { %v153_v29 = vrot.slane %v152_v25, 1 }
  0x24   :  { %v154_v34 = vadd.f32 %v153_v29, %v152_v25 }
  0x26   :  { %v155_v35 = vmul.f32 %v154_v34, %v32_v6  ;;  %v156_v36 = vmul.f32 %v154_v34, %v33_v7  ;;  %v157_v37 = vmul.f32 %v154_v34, %v34_v8  ;;  %v158_v38 = vmul.f32 %v154_v34, %v35_v13 }
  0x28   :  { %v159_v39 = vsub.f32 %v138_v30, %v155_v35  ;;  %v160_v40 = vsub.f32 %v139_v31, %v156_v36  ;;  %v161_v41 = vsub.f32 %v140_v32, %v157_v37  ;;  %v162_v42 = vsub.f32 %v141_v33, %v158_v38 }
  0x2a   :  { %v163_v43 = vmul.f32 %v159_v39, %v159_v39  ;;  %v164_v44 = vmul.f32 %v160_v40, %v160_v40  ;;  %v165_v45 = vmul.f32 %v161_v41, %v161_v41  ;;  %v166_v46 = vmul.f32 %v162_v42, %v162_v42 }
  0x2c   :  { %v167_v47 = vadd.f32 %v164_v44, %v163_v43 }
  0x2e   :  { %v168_v48 = vadd.f32 %v167_v47, %v165_v45 }
  0x30   :  { %v169_v49 = vadd.f32 %v168_v48, %v166_v46 }
  0x32   :  { %v170_v50 = vrot.slane %v169_v49, 4 }
  0x34   :  { %v171_v51 = vadd.f32 %v170_v50, %v169_v49 }
  0x36   :  { %v172_v52 = vrot.slane %v171_v51, 2 }
  0x38   :  { %v173_v53 = vadd.f32 %v172_v52, %v171_v51 }
  0x3a   :  { %v174_v54 = vrot.slane %v173_v53, 1 }
  0x3c   :  { %v175_v55 = vadd.f32 %v174_v54, %v173_v53 }
  0x3e   :  { %195 = vrsqrt.f32 %v175_v55  ;;  %vm178_vm0 = vcmp.eq.f32.partialorder %v175_v55, inf  ;;  %v181_v57 = vand.u32 2147483648, %v175_v55  ;;  %vm180_vm1 = vcmp.eq.f32.partialorder %v175_v55, 0.0 }
  0x4b   :  { %v196_v56 = vpop.eup %195 }
  0x4c   :  { %v177_v58 = vmul.f32 %v196_v56, %v175_v55 }
  0x4e   :  { %v179_v59 = vsel %vm178_vm0, %v175_v55, %v177_v58 }
  0x4f   :  { %v182_v60 = vsel %vm180_vm1, %v181_v57, %v179_v59 }
  0x50   :  { %v183_v61 = vsub.f32 0.0, %v182_v60 }
  0x52   :  { %184 = vst [vmem:[%s373_s9] sm:$0x1] %v183_v61 }

</bundles_post_ra>
